<compile_context>
chip_gen: v5e
topology: v5e:2x2
jax: 0.10.0
libtpu: 0.0.40
codegen_flags: <defaults>
</compile_context>

<pallas_src>
import jax
import jax.numpy as jnp
from jax.experimental import pallas as pl
from jax.experimental.pallas import tpu as pltpu


_LANE = 128
_SUBLANE = 8
_NORM_EPS = 1e-12           # F.normalize eps


def _round_up(x, m):
    return int(pl.cdiv(x, m) * m)


# ----------------------------------------------------------------------------
# Kernel
# ----------------------------------------------------------------------------
def _learn2compare_kernel(f_ref, xr_ref, supw_ref, wbb_ref, bbb_ref,
                          cls_ref, box_ref):
    # ---- classification branch: cosine similarity vs support prototypes ----
    # supw_ref already holds (20 * normalize(sup)).T, zero-padded to 128 lanes.
    f = f_ref[...]                                          # (tile_n, C) bf16
    f32 = f.astype(jnp.float32)
    sumsq = jnp.sum(f32 * f32, axis=-1, keepdims=True)      # (tile_n, 1)
    # 1 / max(||f||, eps)  ==  rsqrt(max(||f||^2, eps^2))   (EUP, free slot)
    inv_norm = jax.lax.rsqrt(jnp.maximum(sumsq, _NORM_EPS * _NORM_EPS))
    raw = jnp.dot(f, supw_ref[...], preferred_element_type=jnp.float32)
    cls_ref[...] = raw * inv_norm                           # per-row scale (VPU)

    # ---- bbox branch: Linear(C, 4) with pre-tiled / padded weights ---------
    # wbb_ref columns already carry the repeat -> lane-dense unmasked store.
    box_ref[...] = (
        jnp.dot(xr_ref[...], wbb_ref[...], preferred_element_type=jnp.float32)
        + bbb_ref[...]
    )


# ----------------------------------------------------------------------------
# Parameter container / wrapper
# ----------------------------------------------------------------------------
class FPNPredictorLearn2ComparePallas:
    def __init__(self, key, in_channels, num_classes, cls_agnostic_bbox_reg=False,
                 compute_dtype=jnp.bfloat16, tile_n=512):
        self.in_channels = in_channels
        self.num_bbox_reg_classes = 2 if cls_agnostic_bbox_reg else num_classes
        self.compute_dtype = compute_dtype
        self.tile_n = tile_n

        # nn.Linear(representation_size, 4): weight (4, C) std=0.001, bias 0.
        # Store transposed (C, 4) once as concrete arrays (no lazy transpose).
        self.wr = jnp.asarray(
            (0.001 * jax.random.normal(key, (4, in_channels), jnp.float32)).T)
        self.br = jnp.zeros((1, 4), jnp.float32)

        # Pre-tile to (C, 4*num_bbox_reg_classes) so `.repeat(1, k)` comes straight
        # out of the MXU, then zero-pad to a lane-dense width.
        self.b_cols = 4 * self.num_bbox_reg_classes
        self.b_pad = _round_up(self.b_cols, _LANE)
        wr_tiled = jnp.tile(self.wr, (1, self.num_bbox_reg_classes))
        br_tiled = jnp.tile(self.br, (1, self.num_bbox_reg_classes))
        self.wr_packed = jnp.asarray(
            jnp.pad(wr_tiled, ((0, 0), (0, self.b_pad - self.b_cols))),
            compute_dtype)
        self.br_packed = jnp.asarray(
            jnp.pad(br_tiled, ((0, 0), (0, self.b_pad - self.b_cols))),
            jnp.float32)

    def __call__(self, f_roi_logits, sup_features_logits, xr, label=None):
        n, c = f_roi_logits.shape
        s = sup_features_logits.shape[0]
        assert c == self.in_channels and xr.shape == (n, c)

        # ---- operand prep (layout plumbing, plain XLA, once per call) -------
        # Support prototypes: L2-normalize, fold in the x20 scale, transpose to
        # (C, S) and zero-pad columns to a lane-dense width.
        sup = sup_features_logits.astype(jnp.float32)
        sup_norm = sup / jnp.maximum(
            jnp.sqrt(jnp.sum(sup * sup, axis=-1, keepdims=True)), _NORM_EPS)
        s_pad = _round_up(s, _LANE)
        sup_w = jnp.asarray(
            jnp.pad((20.0 * sup_norm).T, ((0, 0), (0, s_pad - s))),
            self.compute_dtype)

        # ROI features: bf16 at the boundary; pad N up to the row-tile size.
        tile_n = min(self.tile_n, _round_up(n, _SUBLANE))
        n_pad = _round_up(n, tile_n)
        f_x = jnp.pad(f_roi_logits, ((0, n_pad - n), (0, 0))).astype(self.compute_dtype)
        xr_x = jnp.pad(xr, ((0, n_pad - n), (0, 0))).astype(self.compute_dtype)

        itemsize = jnp.dtype(self.compute_dtype).itemsize
        cost = pl.CostEstimate(
            flops=int(2 * n_pad * c * (s_pad + self.b_pad)),
            transcendentals=int(n_pad),
            bytes_accessed=int(
                2 * n_pad * c * itemsize                      # f_roi + xr
                + (c * (s_pad + self.b_pad)) * itemsize       # sup_w + wr
                + self.b_pad * 4                              # bias
                + n_pad * (s_pad + self.b_pad) * 4),          # outputs
        )

        cls_pad, box_pad = pl.pallas_call(
            _learn2compare_kernel,
            out_shape=(
                jax.ShapeDtypeStruct((n_pad, s_pad), jnp.float32),
                jax.ShapeDtypeStruct((n_pad, self.b_pad), jnp.float32),
            ),
            grid=(n_pad // tile_n,),
            in_specs=[
                pl.BlockSpec((tile_n, c), lambda i: (i, 0)),          # f_roi tile
                pl.BlockSpec((tile_n, c), lambda i: (i, 0)),          # xr tile
                pl.BlockSpec((c, s_pad), lambda i: (0, 0)),           # support (resident)
                pl.BlockSpec((c, self.b_pad), lambda i: (0, 0)),      # bbox W (resident)
                pl.BlockSpec((1, self.b_pad), lambda i: (0, 0)),      # bbox b (resident)
            ],
            out_specs=(
                pl.BlockSpec((tile_n, s_pad), lambda i: (i, 0)),
                pl.BlockSpec((tile_n, self.b_pad), lambda i: (i, 0)),
            ),
            compiler_params=pltpu.CompilerParams(
                dimension_semantics=("parallel",)),
            cost_estimate=cost,
        )(f_x, xr_x, sup_w, self.wr_packed, self.br_packed)

        # Slice padding off (lane-dense in-kernel stores, cheap XLA slice here).
        return cls_pad[:n, :s], box_pad[:n, :self.b_cols]


# ----------------------------------------------------------------------------
# Main
# ----------------------------------------------------------------------------
if __name__ == "__main__":
    key = jax.random.PRNGKey(0)
    k_w, k_f, k_sup, k_xr = jax.random.split(key, 4)

    N_ROIS = 8              # number of ROI proposals
    IN_CHANNELS = 32        # representation size
    NUM_CLASSES = 8         # cfg.MODEL.ROI_BOX_HEAD.NUM_CLASSES
    SUP_BATCH = 8           # number of support prototypes
    CLS_AGNOSTIC = False    # cfg.MODEL.CLS_AGNOSTIC_BBOX_REG

    predictor = FPNPredictorLearn2ComparePallas(
        k_w, IN_CHANNELS, NUM_CLASSES, cls_agnostic_bbox_reg=CLS_AGNOSTIC)

    f_roi = jax.random.normal(k_f, (N_ROIS, IN_CHANNELS), jnp.float32)
    sup = jax.random.normal(k_sup, (SUP_BATCH, IN_CHANNELS), jnp.float32)
    xr = jax.random.normal(k_xr, (N_ROIS, IN_CHANNELS), jnp.float32)

    cls_score, bbox_deltas = predictor(f_roi, sup, xr)
    cls_score = jax.block_until_ready(cls_score)
    bbox_deltas = jax.block_until_ready(bbox_deltas)

    # f32 reference (PyTorch semantics)
    f_n = f_roi / jnp.maximum(jnp.linalg.norm(f_roi, axis=-1, keepdims=True), 1e-12)
    s_n = sup / jnp.maximum(jnp.linalg.norm(sup, axis=-1, keepdims=True), 1e-12)
    ref_cls = 20.0 * (f_n @ s_n.T)
    ref_box = jnp.tile(xr @ predictor.wr + predictor.br,
                       (1, predictor.num_bbox_reg_classes))

    assert cls_score.shape == (N_ROIS, SUP_BATCH)
    assert bbox_deltas.shape == (N_ROIS, 4 * predictor.num_bbox_reg_classes)
    # bf16 matmul inputs (f32 accumulation) -> loosened tolerances vs f32 reference.
    assert jnp.allclose(cls_score, ref_cls, atol=0.3, rtol=3e-2), (
        "cls max err", float(jnp.max(jnp.abs(cls_score - ref_cls))))
    assert jnp.allclose(bbox_deltas, ref_box, atol=2e-3, rtol=3e-2), (
        "bbox max err", float(jnp.max(jnp.abs(bbox_deltas - ref_box))))

    print("KERNEL_OK")
</pallas_src>

<mosaic_0001>
module attributes {stable_mosaic.version = 11 : i64} {
  func.func @_learn2compare_kernel(%arg0: i32, %arg1: memref<8x32xbf16, #tpu.memory_space<vmem>>, %arg2: memref<8x32xbf16, #tpu.memory_space<vmem>>, %arg3: memref<32x128xbf16, #tpu.memory_space<vmem>>, %arg4: memref<32x128xbf16, #tpu.memory_space<vmem>>, %arg5: memref<1x128xf32, #tpu.memory_space<vmem>>, %arg6: memref<8x128xf32, #tpu.memory_space<vmem>>, %arg7: memref<8x128xf32, #tpu.memory_space<vmem>>) attributes {dimension_semantics = [#tpu.dimension_semantics<parallel>], iteration_bounds = array<i64: 1>, scalar_prefetch = 0 : i64, scratch_operands = 0 : i64, tpu.core_type = #tpu.core_type<tc>, window_params = [{transform_indices = @transform_0, window_bounds = array<i64: 8, 32>}, {transform_indices = @transform_1, window_bounds = array<i64: 8, 32>}, {pipeline_mode = #tpu.pipeline_mode<synchronous>, transform_indices = @transform_2, window_bounds = array<i64: 32, 128>}, {pipeline_mode = #tpu.pipeline_mode<synchronous>, transform_indices = @transform_3, window_bounds = array<i64: 32, 128>}, {pipeline_mode = #tpu.pipeline_mode<synchronous>, transform_indices = @transform_4, window_bounds = array<i64: 1, 128>}, {transform_indices = @transform_5, window_bounds = array<i64: 8, 128>}, {transform_indices = @transform_6, window_bounds = array<i64: 8, 128>}]} {
    %c0 = arith.constant 0 : index
    %c0_0 = arith.constant 0 : index
    %0 = vector.load %arg1[%c0, %c0_0] : memref<8x32xbf16, #tpu.memory_space<vmem>>, vector<8x32xbf16>
    %1 = arith.extf %0 : vector<8x32xbf16> to vector<8x32xf32>
    %2 = arith.mulf %1, %1 : vector<8x32xf32>
    %cst = arith.constant dense<0.000000e+00> : vector<8xf32>
    %3 = vector.multi_reduction <add>, %2, %cst [1] : vector<8x32xf32> to vector<8xf32>
    %4 = vector.shape_cast %3 : vector<8xf32> to vector<8x1xf32>
    %cst_1 = arith.constant 1.000000e-24 : f32
    %5 = vector.broadcast %cst_1 : f32 to vector<8x1xf32>
    %6 = arith.maximumf %4, %5 : vector<8x1xf32>
    %7 = math.rsqrt %6 : vector<8x1xf32>
    %c0_2 = arith.constant 0 : index
    %c0_3 = arith.constant 0 : index
    %8 = vector.load %arg3[%c0_2, %c0_3] : memref<32x128xbf16, #tpu.memory_space<vmem>>, vector<32x128xbf16>
    %cst_4 = arith.constant dense<0.000000e+00> : vector<8x128xf32>
    %9 = tpu.matmul %0, %8, %cst_4 {dimension_numbers = #tpu.dot_dimension_numbers<[1], [0], [0], [1], [0, 0, 1, 1], [], []>} : vector<8x32xbf16>, vector<32x128xbf16>, vector<8x128xf32> -> vector<8x128xf32>
    %10 = vector.broadcast %7 : vector<8x1xf32> to vector<8x128xf32>
    %11 = arith.mulf %9, %10 : vector<8x128xf32>
    %c0_5 = arith.constant 0 : index
    %c0_6 = arith.constant 0 : index
    %12 = vector.load %arg6[%c0_5, %c0_6] : memref<8x128xf32, #tpu.memory_space<vmem>>, vector<8x128xf32>
    tpu.vector_store %arg6[%c0_5, %c0_6], %11 {strides = array<i32>} : memref<8x128xf32, #tpu.memory_space<vmem>>, vector<8x128xf32>,
    %c0_7 = arith.constant 0 : index
    %c0_8 = arith.constant 0 : index
    %13 = vector.load %arg2[%c0_7, %c0_8] : memref<8x32xbf16, #tpu.memory_space<vmem>>, vector<8x32xbf16>
    %c0_9 = arith.constant 0 : index
    %c0_10 = arith.constant 0 : index
    %14 = vector.load %arg4[%c0_9, %c0_10] : memref<32x128xbf16, #tpu.memory_space<vmem>>, vector<32x128xbf16>
    %cst_11 = arith.constant dense<0.000000e+00> : vector<8x128xf32>
    %15 = tpu.matmul %13, %14, %cst_11 {dimension_numbers = #tpu.dot_dimension_numbers<[1], [0], [0], [1], [0, 0, 1, 1], [], []>} : vector<8x32xbf16>, vector<32x128xbf16>, vector<8x128xf32> -> vector<8x128xf32>
    %c0_12 = arith.constant 0 : index
    %c0_13 = arith.constant 0 : index
    %16 = vector.load %arg5[%c0_12, %c0_13] : memref<1x128xf32, #tpu.memory_space<vmem>>, vector<1x128xf32>
    %17 = vector.broadcast %16 : vector<1x128xf32> to vector<8x128xf32>
    %18 = arith.addf %15, %17 : vector<8x128xf32>
    %c0_14 = arith.constant 0 : index
    %c0_15 = arith.constant 0 : index
    %19 = vector.load %arg7[%c0_14, %c0_15] : memref<8x128xf32, #tpu.memory_space<vmem>>, vector<8x128xf32>
    tpu.vector_store %arg7[%c0_14, %c0_15], %18 {strides = array<i32>} : memref<8x128xf32, #tpu.memory_space<vmem>>, vector<8x128xf32>,
    return
  }
  func.func @transform_0(%arg0: i32) -> (i32, i32) {
    %c0_i32 = arith.constant 0 : i32
    %c0_i32_0 = arith.constant 0 : i32
    return %arg0, %c0_i32 : i32, i32
  }
  func.func @transform_1(%arg0: i32) -> (i32, i32) {
    %c0_i32 = arith.constant 0 : i32
    %c0_i32_0 = arith.constant 0 : i32
    return %arg0, %c0_i32 : i32, i32
  }
  func.func @transform_2(%arg0: i32) -> (i32, i32) {
    %c0_i32 = arith.constant 0 : i32
    %c0_i32_0 = arith.constant 0 : i32
    %c0_i32_1 = arith.constant 0 : i32
    return %c0_i32, %c0_i32_0 : i32, i32
  }
  func.func @transform_3(%arg0: i32) -> (i32, i32) {
    %c0_i32 = arith.constant 0 : i32
    %c0_i32_0 = arith.constant 0 : i32
    %c0_i32_1 = arith.constant 0 : i32
    return %c0_i32, %c0_i32_0 : i32, i32
  }
  func.func @transform_4(%arg0: i32) -> (i32, i32) {
    %c0_i32 = arith.constant 0 : i32
    %c0_i32_0 = arith.constant 0 : i32
    %c0_i32_1 = arith.constant 0 : i32
    return %c0_i32, %c0_i32_0 : i32, i32
  }
  func.func @transform_5(%arg0: i32) -> (i32, i32) {
    %c0_i32 = arith.constant 0 : i32
    %c0_i32_0 = arith.constant 0 : i32
    return %arg0, %c0_i32 : i32, i32
  }
  func.func @transform_6(%arg0: i32) -> (i32, i32) {
    %c0_i32 = arith.constant 0 : i32
    %c0_i32_0 = arith.constant 0 : i32
    return %arg0, %c0_i32 : i32, i32
  }
}

</mosaic_0001>

<bundles_post_ra>
// kernel: tpu_custom_call.1
= control target key start
LH: loop header
LB: loop body
LE: loop exit
PB: predicated region body
PF: predicated region fallthrough
CT: control target
= control target key end

     0   :  { %12 = vsyncpa [#allocation3], 0  ;;  %s460_s0 = inlined_call_operand.hbm [shape: bf16[8,32], index: 0, kind: input, shape index: {}]   ;;  %s461_s1 = inlined_call_operand.hbm [shape: bf16[8,32], index: 1, kind: input, shape index: {}]   ;;  %s462_s2 = inlined_call_operand.hbm [shape: bf16[32,128], index: 2, kind: input, shape index: {}]   ;;  %s463_s3 = inlined_call_operand.hbm [shape: bf16[32,128], index: 3, kind: input, shape index: {}]   ;;  %s464_s4 = inlined_call_operand.vmem [shape: f32[1,128], index: 4, kind: input, shape index: {}]   ;;  %s465_s5 = inlined_call_operand.hbm [shape: f32[8,128], index: 5, kind: output, shape index: {0}]   ;;  %s466_s6 = inlined_call_operand.hbm [shape: f32[8,128], index: 6, kind: output, shape index: {1}]  }
   0x1   :  { %13 = vsyncpa [#allocation6], 0 }
   0x2   :  { %14 = vsyncpa [#allocation9], 0 }
   0x3   :  { %15 = vsyncpa [#allocation4], 0  ;;  %s33_s23 = sshll.u32 %s461_s1, 4  ;;  %s34_s23 = int_to_ptr.hbm [resolvable:$true] %s33_s23 }
   0x4   :  { %16 = vsyncpa [#allocation12], 0  ;;  %s396_s24 = smov [#allocation5]   ;;  %s22_s28 = sshll.u32 %s460_s0, 4  ;;  %s23_s28 = int_to_ptr.hbm [resolvable:$true] %s22_s28 }
   0x5   :  { %s35_s25 = sshll.u32 %s396_s24, 4  ;;  %s397_s29 = smov [#allocation2]   ;;  %s36_s25 = int_to_ptr.vmem [resolvable:$true] %s35_s25 }
   0x6   :  { %38 = dma.hbm_to_vmem [thread:$0]  %s34_s23, 64, %s36_s25, [#allocation6]  }
   0x7   :  { %s24_s30 = sshll.u32 %s397_s29, 4  ;;  %s43_s9 = sshll.u32 %s462_s2, 4  ;;  %s25_s30 = int_to_ptr.vmem [resolvable:$true] %s24_s30  ;;  %s44_s9 = int_to_ptr.hbm [resolvable:$true] %s43_s9 }
   0x8   :  { %27 = dma.hbm_to_vmem [thread:$0]  %s23_s28, 64, %s25_s30, [#allocation3]  }
   0x9   :  { %s398_s1 = smov [#allocation7]   ;;  %s56_s13 = sshll.u32 %s463_s3, 4  ;;  %s57_s13 = int_to_ptr.hbm [resolvable:$true] %s56_s13 }
   0xa   :  { %s45_s10 = sshll.u32 %s398_s1, 4  ;;  %s399_s14 = smov 64   ;;  %s46_s10 = int_to_ptr.vmem [resolvable:$true] %s45_s10 }
   0xb   :  { %s400_s0 = smov 4   ;;  %s401_s15 = smov [#allocation8]  }
   0xc   :  { %51 = dma.hbm_to_vmem [thread:$0]  %s44_s9, 256, %s46_s10, [#allocation6], %s399_s14, %s399_s14, %s400_s0  }
   0xd   :  { %s58_s16 = sshll.u32 %s401_s15, 4  ;;  %s59_s16 = int_to_ptr.vmem [resolvable:$true] %s58_s16 }
   0xe   :  { %64 = dma.hbm_to_vmem [thread:$0]  %s57_s13, 256, %s59_s16, [#allocation9], %s399_s14, %s399_s14, %s400_s0  }
   0xf   :  { %386 = dma.done.wait [#allocation3], 64  }
  0x10   :  { %387 = vsyncadd [#allocation3], 4294967232 }
  0x11   :  { %388 = dma.done.wait [#allocation6], 320  }
  0x12   :  { %389 = vsyncadd [#allocation6], 4294966976 }
  0x13   :  { %390 = dma.done.wait [#allocation9], 256  }
  0x14   :  { %391 = vsyncadd [#allocation9], 4294967040  ;;  %v228_v0 = vld [vmem:[#allocation7 + $0x8] sm:$0xff]  ;;  %v230_v1 = vld [vmem:[#allocation8 + $0x8] sm:$0xff]  ;;  %vm87_vm0 = vcmask 261120   ;;  %s402_s17 = smov [#allocation11]  }
  0x15   :  { %v84_v2 = vld [vmem:[#allocation2] sm:$0xf]  ;;  %127 = vmatpush.bf16.msra.mxu0 %v228_v0  ;;  %166 = vmatpush.bf16.msra.mxu1 %v230_v1  ;;  %v227_v4 = vld [vmem:[#allocation7] sm:$0xff]  ;;  %v229_v6 = vld [vmem:[#allocation8] sm:$0xff]  ;;  %s190_s18 = sshll.u32 %s402_s17, 4  ;;  %s192_s21 = sshll.u32 %s466_s6, 4  ;;  %s191_s18 = int_to_ptr.vmem [resolvable:$true] %s190_s18  ;;  %s193_s21 = int_to_ptr.hbm [resolvable:$true] %s192_s21 }
  0x16   :  { %v85_v3 = vunpack.c.l.bf16 %v84_v2  ;;  %v136_v8 = vld [vmem:[#allocation5] sm:$0xf]  ;;  %v239_v13 = vld [vmem:[%s464_s4] ss:$0 sm:$0xff]  ;;  %s403_s22 = smov [#allocation10]   ;;  %s181_s25 = sshll.u32 %s465_s5, 4  ;;  %s182_s25 = int_to_ptr.hbm [resolvable:$true] %s181_s25 }
  0x17   :  { %s179_s23 = sshll.u32 %s403_s22, 4  ;;  %s180_s23 = int_to_ptr.vmem [resolvable:$true] %s179_s23 }
  0x18   :  { %v86_v5 = vmul.f32 %v85_v3, %v85_v3 }
  0x19   :  { %128 = vmatpush.bf16.msra.mxu0 %v227_v4  ;;  %167 = vmatpush.bf16.msra.mxu1 %v229_v6 }
  0x1a   :  { %v88_v7 = vsel %vm87_vm0, %v86_v5, 0.0 }
  0x1b   :  { %89 = vadd.xlane.f32.xlu0 %v88_v7 }
  0x1c   :  { %217 = vmatmul.msk.bf16.vlgmr.msra.gmra.mxu0 %vm87_vm0, %v84_v2  ;;  %226 = vmatmul.msk.bf16.vlgmr.msra.gmra.mxu1 %vm87_vm0, %v136_v8 }
  0x8e   :  { %v90_v9 = vpop.xlane.xlu0 %89 }
  0x8f   :  { %v91_v10 = vmax.f32 %v90_v9, 1e-24 }
  0x91   :  { %240 = vrsqrt.f32 %v91_v10  ;;  %vm98_vm2 = vweird.f32 %v91_v10 }
  0x97   :  { %v241_v11 = vpop.eup %240 }
  0x98   :  { %v93_v12 = vmul.f32 %v241_v11, %v91_v10  ;;  %vm99_vm1 = vweird.f32 %v241_v11 }
  0x99   :  { %v130_v15 = vpop.f32.mrf.mxu0  ;;  %v169_v17 = vpop.f32.mrf.mxu1  ;;  %vm100_vm3 = vmor %vm98_vm2, %vm99_vm1 }
  0x9a   :  { %v94_v14 = vmul.f32 %v241_v11, %v93_v12  ;;  %v170_v18 = vadd.f32 %v239_v13, %v169_v17 }
  0x9c   :  { %v95_v16 = vmul.f32 0.5, %v94_v14  ;;  %173 = vst [vmem:[#allocation11] sm:$0xff] %v170_v18 }
  0x9d   :  { %195 = dma.vmem_to_hbm [thread:$0]  %s191_s18, 128, %s193_s21, [#allocation12]  }
  0x9e   :  { %v96_v19 = vsub.f32 1.5, %v95_v16 }
  0xa0   :  { %v97_v20 = vmul.f32 %v241_v11, %v96_v19 }
  0xa1   :  { %v132_v23 = vpop.f32.mrf.mxu0  ;;  %v171_v24 = vpop.f32.mrf.mxu1 }
  0xa2   :  { %v101_v21 = vsel %vm100_vm3, %v241_v11, %v97_v20 }
  0xa3   :  { %v134_v22 = vmul.f32 %v130_v15, %v101_v21 }
  0xa5   :  { %135 = vst [vmem:[#allocation10] sm:$0xff] %v134_v22 }
  0xa6   :  { %184 = dma.vmem_to_hbm [thread:$0]  %s180_s23, 128, %s182_s25, [#allocation4]  }
  0xa7   :  { %392 = dma.done.wait [#allocation4], 128  }
  0xa8   :  { %393 = vsyncadd [#allocation4], 4294967168 }
  0xa9   :  { %394 = dma.done.wait [#allocation12], 128  }
  0xaa   :  { %395 = vsyncadd [#allocation12], 4294967168 }
  0xab   :  { %204 = vsyncpa [#allocation3], 1 }
  0xac   :  { %205 = vsyncpa [#allocation6], 1 }
  0xad   :  { %206 = vsyncpa [#allocation9], 1 }
  0xae   :  { %207 = vsyncpa [#allocation4], 1 }
  0xaf   :  { %208 = vsyncpa [#allocation12], 1 }

</bundles_post_ra>
